<compile_context>
chip_gen: v5e
topology: v5e:2x2
jax: 0.10.0
libtpu: 0.0.40
codegen_flags: <defaults>
</compile_context>

<pallas_src>
import jax
import jax.numpy as jnp
from jax.experimental import pallas as pl
from jax.experimental.pallas import tpu as pltpu

_LANE = 128  # TPU lane width; output last dim is padded to a multiple of this.


def _siamese_kernel(x1_ref, x2_ref, w1_ref, b1_ref, w2_ref, b2_ref, o_ref):
    # x1_ref, x2_ref : (B, D)      f32   flattened branch inputs
    # w1_ref         : (D, H)      bf16  shared layer-1 weights
    # b1_ref         : (1, H)      f32
    # w2_ref         : (H, E_pad)  bf16  shared layer-2 weights (lane-padded)
    # b2_ref         : (1, E_pad)  f32
    # o_ref          : (2B, E_pad) f32   both branches' embeddings, lane-dense

    # Fuse the two branches into one MXU matmul: stack in VMEM -> (2B, D).
    x = jnp.concatenate([x1_ref[...], x2_ref[...]], axis=0)

    # Layer 1: bf16 MXU operands, f32 accumulation, f32 bias+ReLU epilogue.
    h = jnp.dot(x.astype(jnp.bfloat16), w1_ref[...],
                preferred_element_type=jnp.float32)          # (2B, H) f32
    h = jnp.maximum(h + b1_ref[...], 0.0)

    # Layer 2: bf16 MXU operands, f32 accumulation, f32 bias epilogue.
    y = jnp.dot(h.astype(jnp.bfloat16), w2_ref[...],
                preferred_element_type=jnp.float32)          # (2B, E_pad) f32
    o_ref[...] = (y + b2_ref[...]).astype(o_ref.dtype)


def siamese_forward(x1, x2, params):
    """Apply the shared single_pass_net to x1 and x2. Returns (e1, e2)."""
    w1, b1, w2, b2 = params          # w1/w2 bf16, b1/b2 f32
    B = x1.shape[0]
    D, Hdim = w1.shape
    E = w2.shape[1]

    # Pad the embedding dim to a lane-dense multiple of 128 (zero columns).
    E_pad = ((E + _LANE - 1) // _LANE) * _LANE
    if E_pad != E:
        w2p = jnp.pad(w2, ((0, 0), (0, E_pad - E)))
        b2p = jnp.pad(b2, ((0, 0), (0, E_pad - E)))
    else:
        w2p, b2p = w2, b2

    # Flatten NCHW -> [B, D] exactly like torch .view(B, -1). No stacking in
    # HBM: both branches are passed separately and fused inside the kernel.
    x1f = x1.reshape(B, -1)
    x2f = x2.reshape(B, -1)

    # Advisory cost estimate (DMA-dominated kernel).
    flops = 2 * (2 * B) * D * Hdim + 2 * (2 * B) * Hdim * E_pad
    bytes_accessed = (2 * B * D * 4                 # inputs (f32)
                      + D * Hdim * 2                # W1 (bf16)
                      + Hdim * E_pad * 2            # W2 (bf16)
                      + (Hdim + E_pad) * 4          # biases (f32)
                      + 2 * B * E_pad * 4)          # output (f32)

    # VMEM budget from actual buffer math (+ padding/intermediate headroom).
    vmem_needed = (2 * B * D * 4
                   + D * max(Hdim, _LANE) * 2
                   + max(Hdim, _LANE) * E_pad * 2
                   + (max(Hdim, _LANE) + E_pad) * 4
                   + 2 * B * E_pad * 4
                   + 2 * B * max(D, _LANE) * 4)
    vmem_limit = int(min(64 * 1024 * 1024, max(8 * 1024 * 1024, 4 * vmem_needed)))

    vmem = pltpu.MemorySpace.VMEM
    out = pl.pallas_call(
        _siamese_kernel,
        out_shape=jax.ShapeDtypeStruct((2 * B, E_pad), jnp.float32),
        # No grid: single kernel invocation, whole arrays resident in VMEM,
        # shared weights single-buffered.
        in_specs=[pl.BlockSpec(memory_space=vmem)] * 6,
        out_specs=pl.BlockSpec(memory_space=vmem),
        compiler_params=pltpu.CompilerParams(vmem_limit_bytes=vmem_limit),
        cost_estimate=pl.CostEstimate(flops=flops, transcendentals=0,
                                      bytes_accessed=bytes_accessed),
    )(x1f, x2f, w1, b1, w2p, b2p)

    emb = out[:, :E]                  # drop lane padding
    return emb[:B], emb[B:]


def init_params(key, in_dim, hidden, embed):
    k1, k2, k3, k4 = jax.random.split(key, 4)
    # Weights stored in bf16 (MXU operands); biases kept in f32 (VPU epilogue).
    w1 = (jax.random.normal(k1, (in_dim, hidden), jnp.float32) * 0.02).astype(jnp.bfloat16)
    b1 = jax.random.normal(k2, (1, hidden), jnp.float32) * 0.02
    w2 = (jax.random.normal(k3, (hidden, embed), jnp.float32) * 0.02).astype(jnp.bfloat16)
    b2 = jax.random.normal(k4, (1, embed), jnp.float32) * 0.02
    return (w1, b1, w2, b2)


if __name__ == "__main__":
    # Small shapes consistent with the forward pass: two NCHW image batches.
    B, C, H, W = 2, 4, 16, 16
    HIDDEN, EMBED = 32, 32
    D = C * H * W

    key = jax.random.PRNGKey(0)
    kx1, kx2, kp = jax.random.split(key, 3)
    x1 = jax.random.normal(kx1, (B, C, H, W), jnp.float32)
    x2 = jax.random.normal(kx2, (B, C, H, W), jnp.float32)
    params = init_params(kp, D, HIDDEN, EMBED)

    e1, e2 = siamese_forward(x1, x2, params)
    jax.block_until_ready((e1, e2))

    # Reference check (plain JAX, f32 math on the same bf16-stored weights)
    # to confirm shared-weight siamese semantics.
    w1f = params[0].astype(jnp.float32)
    b1f = params[1]
    w2f = params[2].astype(jnp.float32)
    b2f = params[3]

    def ref_single(x):
        h = jnp.maximum(x.reshape(B, -1) @ w1f + b1f, 0.0)
        return h @ w2f + b2f

    r1, r2 = ref_single(x1), ref_single(x2)
    assert e1.shape == (B, EMBED) and e2.shape == (B, EMBED)
    assert jnp.allclose(e1, r1, atol=1e-2, rtol=1e-2), "branch 1 mismatch"
    assert jnp.allclose(e2, r2, atol=1e-2, rtol=1e-2), "branch 2 mismatch"

    print("KERNEL_OK")
</pallas_src>

<mosaic_0001>
module attributes {stable_mosaic.version = 11 : i64} {
  func.func @_siamese_kernel(%arg0: memref<2x1024xf32, #tpu.memory_space<vmem>>, %arg1: memref<2x1024xf32, #tpu.memory_space<vmem>>, %arg2: memref<1024x32xbf16, #tpu.memory_space<vmem>>, %arg3: memref<1x32xf32, #tpu.memory_space<vmem>>, %arg4: memref<32x128xbf16, #tpu.memory_space<vmem>>, %arg5: memref<1x128xf32, #tpu.memory_space<vmem>>, %arg6: memref<4x128xf32, #tpu.memory_space<vmem>>) attributes {dimension_semantics = [], scalar_prefetch = 0 : i64, scratch_operands = 0 : i64, tpu.core_type = #tpu.core_type<tc>} {
    %c0 = arith.constant 0 : index
    %c0_0 = arith.constant 0 : index
    %0 = vector.load %arg0[%c0, %c0_0] : memref<2x1024xf32, #tpu.memory_space<vmem>>, vector<2x1024xf32>
    %c0_1 = arith.constant 0 : index
    %c0_2 = arith.constant 0 : index
    %1 = vector.load %arg1[%c0_1, %c0_2] : memref<2x1024xf32, #tpu.memory_space<vmem>>, vector<2x1024xf32>
    %2 = tpu.concatenate %0, %1 in 0 : vector<2x1024xf32>, vector<2x1024xf32> -> vector<4x1024xf32>
    %3 = arith.truncf %2 : vector<4x1024xf32> to vector<4x1024xbf16>
    %c0_3 = arith.constant 0 : index
    %c0_4 = arith.constant 0 : index
    %4 = vector.load %arg2[%c0_3, %c0_4] : memref<1024x32xbf16, #tpu.memory_space<vmem>>, vector<1024x32xbf16>
    %cst = arith.constant dense<0.000000e+00> : vector<4x32xf32>
    %5 = tpu.matmul %3, %4, %cst {dimension_numbers = #tpu.dot_dimension_numbers<[1], [0], [0], [1], [0, 0, 1, 1], [], []>} : vector<4x1024xbf16>, vector<1024x32xbf16>, vector<4x32xf32> -> vector<4x32xf32>
    %c0_5 = arith.constant 0 : index
    %c0_6 = arith.constant 0 : index
    %6 = vector.load %arg3[%c0_5, %c0_6] : memref<1x32xf32, #tpu.memory_space<vmem>>, vector<1x32xf32>
    %7 = vector.broadcast %6 : vector<1x32xf32> to vector<4x32xf32>
    %8 = arith.addf %5, %7 : vector<4x32xf32>
    %cst_7 = arith.constant 0.000000e+00 : f32
    %9 = vector.broadcast %cst_7 : f32 to vector<4x32xf32>
    %10 = arith.maximumf %8, %9 : vector<4x32xf32>
    %11 = arith.truncf %10 : vector<4x32xf32> to vector<4x32xbf16>
    %c0_8 = arith.constant 0 : index
    %c0_9 = arith.constant 0 : index
    %12 = vector.load %arg4[%c0_8, %c0_9] : memref<32x128xbf16, #tpu.memory_space<vmem>>, vector<32x128xbf16>
    %cst_10 = arith.constant dense<0.000000e+00> : vector<4x128xf32>
    %13 = tpu.matmul %11, %12, %cst_10 {dimension_numbers = #tpu.dot_dimension_numbers<[1], [0], [0], [1], [0, 0, 1, 1], [], []>} : vector<4x32xbf16>, vector<32x128xbf16>, vector<4x128xf32> -> vector<4x128xf32>
    %c0_11 = arith.constant 0 : index
    %c0_12 = arith.constant 0 : index
    %14 = vector.load %arg5[%c0_11, %c0_12] : memref<1x128xf32, #tpu.memory_space<vmem>>, vector<1x128xf32>
    %15 = vector.broadcast %14 : vector<1x128xf32> to vector<4x128xf32>
    %16 = arith.addf %13, %15 : vector<4x128xf32>
    %c0_13 = arith.constant 0 : index
    %c0_14 = arith.constant 0 : index
    %17 = vector.load %arg6[%c0_13, %c0_14] : memref<4x128xf32, #tpu.memory_space<vmem>>, vector<4x128xf32>
    tpu.vector_store %arg6[%c0_13, %c0_14], %16 {strides = array<i32>} : memref<4x128xf32, #tpu.memory_space<vmem>>, vector<4x128xf32>,
    return
  }
}

</mosaic_0001>

<bundles_post_ra>
// kernel: tpu_custom_call.1
= control target key start
LH: loop header
LB: loop body
LE: loop exit
PB: predicated region body
PF: predicated region fallthrough
CT: control target
= control target key end

     0   :  { %s1400_s0 = inlined_call_operand.vmem [shape: f32[2,1024], index: 0, kind: input, shape index: {}]   ;;  %s1401_s1 = inlined_call_operand.vmem [shape: f32[2,1024], index: 1, kind: input, shape index: {}]   ;;  %s1402_s2 = inlined_call_operand.vmem [shape: bf16[1024,32], index: 2, kind: input, shape index: {}]   ;;  %s1403_s3 = inlined_call_operand.vmem [shape: f32[1,32], index: 3, kind: input, shape index: {}]   ;;  %s1404_s4 = inlined_call_operand.vmem [shape: bf16[32,128], index: 4, kind: input, shape index: {}]   ;;  %s1405_s5 = inlined_call_operand.vmem [shape: f32[1,128], index: 5, kind: input, shape index: {}]   ;;  %s1406_s6 = inlined_call_operand.hbm [shape: f32[4,128], index: 6, kind: output, shape index: {}]  }
   0x1   :  { %v1037_v0 = vld [vmem:[%s1402_s2 + $0x38] sm:$0xff]  ;;  %v1036_v4 = vld [vmem:[%s1402_s2 + $0x30] sm:$0xff]  ;;  %v1035_v8 = vld [vmem:[%s1402_s2 + $0x28] sm:$0xff] }
   0x2   :  { %v1045_v1 = vld [vmem:[%s1402_s2 + $0x78] sm:$0xff]  ;;  %605 = vmatpush.bf16.msra.mxu0 %v1037_v0  ;;  %v1044_v5 = vld [vmem:[%s1402_s2 + $0x70] sm:$0xff]  ;;  %v1043_v9 = vld [vmem:[%s1402_s2 + $0x68] sm:$0xff] }
   0x3   :  { %v1053_v2 = vld [vmem:[%s1402_s2 + $0xb8] sm:$0xff]  ;;  %618 = vmatpush.bf16.msra.mxu1 %v1045_v1  ;;  %v1052_v6 = vld [vmem:[%s1402_s2 + $0xb0] sm:$0xff]  ;;  %v1051_v10 = vld [vmem:[%s1402_s2 + $0xa8] sm:$0xff] }
   0x4   :  { %v1061_v3 = vld [vmem:[%s1402_s2 + $0xf8] sm:$0xff]  ;;  %631 = vmatpush.bf16.msra.mxu2 %v1053_v2  ;;  %v1060_v7 = vld [vmem:[%s1402_s2 + $0xf0] sm:$0xff]  ;;  %v1059_v11 = vld [vmem:[%s1402_s2 + $0xe8] sm:$0xff] }
   0x5   :  { %644 = vmatpush.bf16.msra.mxu3 %v1061_v3  ;;  %v1034_v12 = vld [vmem:[%s1402_s2 + $0x20] sm:$0xff]  ;;  %v1033_v17 = vld [vmem:[%s1402_s2 + $0x18] sm:$0xff]  ;;  %v1032_v21 = vld [vmem:[%s1402_s2 + $0x10] sm:$0xff] }
   0x6   :  { %606 = vmatpush.bf16.msra.mxu0 %v1036_v4  ;;  %v1042_v13 = vld [vmem:[%s1402_s2 + $0x60] sm:$0xff]  ;;  %v1041_v18 = vld [vmem:[%s1402_s2 + $0x58] sm:$0xff]  ;;  %v1040_v22 = vld [vmem:[%s1402_s2 + $0x50] sm:$0xff] }
   0x7   :  { %619 = vmatpush.bf16.msra.mxu1 %v1044_v5  ;;  %v1050_v14 = vld [vmem:[%s1402_s2 + $0xa0] sm:$0xff]  ;;  %v1049_v19 = vld [vmem:[%s1402_s2 + $0x98] sm:$0xff]  ;;  %v26_v23 = vld [vmem:[%s1400_s0 + $0x8] sm:$0xff] }
   0x8   :  { %632 = vmatpush.bf16.msra.mxu2 %v1052_v6  ;;  %v1058_v15 = vld [vmem:[%s1402_s2 + $0xe0] sm:$0xff]  ;;  %v1057_v20 = vld [vmem:[%s1402_s2 + $0xd8] sm:$0xff]  ;;  %v1048_v24 = vld [vmem:[%s1402_s2 + $0x90] sm:$0xff]  ;;  %33 = vst [vmem:[#allocation1 + $0x20] ss:$4 sm:$0xff] %v26_v23 }
   0x9   :  { %645 = vmatpush.bf16.msra.mxu3 %v1060_v7  ;;  %v25_v16 = vld [vmem:[%s1400_s0] sm:$0xff]  ;;  %v1056_v25 = vld [vmem:[%s1402_s2 + $0xd0] sm:$0xff]  ;;  %v1031_v26 = vld [vmem:[%s1402_s2 + $0x8] sm:$0xff] }
   0xa   :  { %607 = vmatpush.bf16.msra.mxu0 %v1035_v8  ;;  %31 = vst [vmem:[#allocation1] ss:$4 sm:$0xff] %v25_v16  ;;  %v1039_v27 = vld [vmem:[%s1402_s2 + $0x48] sm:$0xff]  ;;  %v27_v28 = vld [vmem:[%s1401_s1] sm:$0xff] }
   0xb   :  { %620 = vmatpush.bf16.msra.mxu1 %v1043_v9 }
   0xc   :  { %633 = vmatpush.bf16.msra.mxu2 %v1051_v10 }
   0xd   :  { %646 = vmatpush.bf16.msra.mxu3 %v1059_v11 }
   0xe   :  { %608 = vmatpush.bf16.msra.mxu0 %v1034_v12 }
   0xf   :  { %621 = vmatpush.bf16.msra.mxu1 %v1042_v13 }
  0x10   :  { %634 = vmatpush.bf16.msra.mxu2 %v1050_v14 }
  0x11   :  { %647 = vmatpush.bf16.msra.mxu3 %v1058_v15 }
  0x12   :  { %609 = vmatpush.bf16.msra.mxu0 %v1033_v17 }
  0x13   :  { %622 = vmatpush.bf16.msra.mxu1 %v1041_v18 }
  0x14   :  { %635 = vmatpush.bf16.msra.mxu2 %v1049_v19 }
  0x15   :  { %648 = vmatpush.bf16.msra.mxu3 %v1057_v20 }
  0x16   :  { %11 = vsyncpa [#allocation3], 0  ;;  %v34_v29 = vld.sshfl [vmem:[#allocation1] sm:$0xff pattern:$0x73625140]  ;;  %610 = vmatpush.bf16.msra.mxu0 %v1032_v21  ;;  %v1047_v33 = vld [vmem:[%s1402_s2 + $0x88] sm:$0xff] }
  0x17   :  { %v35_v30 = vld.sshfl [vmem:[#allocation1 + $0x8] sm:$0xff pattern:$0x73625140]  ;;  %623 = vmatpush.bf16.msra.mxu1 %v1040_v22  ;;  %v36_v31 = vld.sshfl [vmem:[#allocation1 + $0x10] sm:$0xff pattern:$0x73625140] }
  0x18   :  { %v37_v32 = vld.sshfl [vmem:[#allocation1 + $0x18] sm:$0xff pattern:$0x73625140]  ;;  %636 = vmatpush.bf16.msra.mxu2 %v1048_v24  ;;  %v1055_v34 = vld [vmem:[%s1402_s2 + $0xc8] sm:$0xff]  ;;  %v1030_v35 = vld [vmem:[%s1402_s2] sm:$0xff]  ;;  %vm72_vm0 = vcmask 1041408  }
  0x19   :  { %649 = vmatpush.bf16.msra.mxu3 %v1056_v25  ;;  %53 = vst [vmem:[#allocation1 + $0x1] ss:$4 sm:$0xff] %v27_v28  ;;  %v1038_v36 = vld [vmem:[%s1402_s2 + $0x40] sm:$0xff]  ;;  %v28_v38 = vld [vmem:[%s1401_s1 + $0x8] sm:$0xff]  ;;  %v1069_v42 = vld [vmem:[%s1402_s2 + $0x138] sm:$0xff]  ;;  %vm731_vm1 = vcmask 261120  }
  0x1a   :  { %v1046_v37 = vld [vmem:[%s1402_s2 + $0x80] sm:$0xff]  ;;  %611 = vmatpush.bf16.msra.mxu0 %v1031_v26  ;;  %v1268_v40 = vld.sshfl [vmem:[#allocation1 + $0x28] sm:$0xff pattern:$0x73625140]  ;;  %v1077_v43 = vld [vmem:[%s1402_s2 + $0x178] sm:$0xff]  ;;  %s1125_s11 = smov [#allocation2]  }
  0x1b   :  { %624 = vmatpush.bf16.msra.mxu1 %v1039_v27  ;;  %v1266_v39 = vld.sshfl [vmem:[#allocation1 + $0x20] sm:$0xff pattern:$0x73625140]  ;;  %v1279_v44 = vld.sshfl [vmem:[#allocation1 + $0x30] sm:$0xff pattern:$0x73625140] }
  0x1c   :  { %637 = vmatpush.bf16.msra.mxu2 %v1047_v33  ;;  %v1054_v41 = vld [vmem:[%s1402_s2 + $0xc0] sm:$0xff]  ;;  %v1281_v45 = vld.sshfl [vmem:[#allocation1 + $0x38] sm:$0xff pattern:$0x73625140]  ;;  %v1068_v54 = vld [vmem:[%s1402_s2 + $0x130] sm:$0xff]  ;;  %s754_s12 = sshll.u32 %s1125_s11, 4  ;;  %s755_s12 = int_to_ptr.vmem [resolvable:$true] %s754_s12 }
  0x1d   :  { %650 = vmatpush.bf16.msra.mxu3 %v1055_v34  ;;  %v1085_v46 = vld [vmem:[%s1402_s2 + $0x1b8] sm:$0xff]  ;;  %55 = vst [vmem:[#allocation1 + $0x21] ss:$4 sm:$0xff] %v28_v38  ;;  %v1076_v55 = vld [vmem:[%s1402_s2 + $0x170] sm:$0xff]  ;;  %v1067_v0 = vld [vmem:[%s1402_s2 + $0x128] sm:$0xff]  ;;  %s756_s15 = sshll.u32 %s1406_s6, 4  ;;  %s757_s15 = int_to_ptr.hbm [resolvable:$true] %s756_s15 }
  0x1e   :  { %v1093_v47 = vld [vmem:[%s1402_s2 + $0x1f8] sm:$0xff]  ;;  %612 = vmatpush.bf16.msra.mxu0 %v1030_v35  ;;  %v1084_v59 = vld [vmem:[%s1402_s2 + $0x1b0] sm:$0xff]  ;;  %v1075_v1 = vld [vmem:[%s1402_s2 + $0x168] sm:$0xff] }
  0x1f   :  { %625 = vmatpush.bf16.msra.mxu1 %v1038_v36  ;;  %v1092_v60 = vld [vmem:[%s1402_s2 + $0x1f0] sm:$0xff]  ;;  %v1083_v2 = vld [vmem:[%s1402_s2 + $0x1a8] sm:$0xff]  ;;  %v1066_v4 = vld [vmem:[%s1402_s2 + $0x120] sm:$0xff] }
  0x20   :  { %v58_v48 = vld.sshfl [vmem:[#allocation1 + $0x10] sm:$0xff pattern:$0x73625140]  ;;  %v56_v49 = vld.sshfl [vmem:[#allocation1] sm:$0xff pattern:$0x73625140]  ;;  %638 = vmatpush.bf16.msra.mxu2 %v1046_v37 }
  0x21   :  { %651 = vmatpush.bf16.msra.mxu3 %v1054_v41  ;;  %v75_v50 = vsel %vm72_vm0, %v36_v31, %v58_v48  ;;  %v73_v51 = vsel %vm72_vm0, %v34_v29, %v56_v49  ;;  %v59_v52 = vld.sshfl [vmem:[#allocation1 + $0x18] sm:$0xff pattern:$0x73625140]  ;;  %v57_v53 = vld.sshfl [vmem:[#allocation1 + $0x8] sm:$0xff pattern:$0x73625140] }
  0x22   :  { %657 = vmatpush.bf16.msrb.mxu0 %v1069_v42  ;;  %v83_v56 = vpack.c.bf16 %v75_v50, %v75_v50  ;;  %v81_v57 = vpack.c.bf16 %v73_v51, %v73_v51  ;;  %v76_v58 = vsel %vm72_vm0, %v37_v32, %v59_v52  ;;  %v74_v62 = vsel %vm72_vm0, %v35_v30, %v57_v53  ;;  %v1091_v3 = vld [vmem:[%s1402_s2 + $0x1e8] sm:$0xff]  ;;  %v1074_v5 = vld [vmem:[%s1402_s2 + $0x160] sm:$0xff]  ;;  %v1065_v8 = vld [vmem:[%s1402_s2 + $0x118] sm:$0xff] }
  0x23   :  { %670 = vmatpush.bf16.msrb.mxu1 %v1077_v43  ;;  %v84_v61 = vpack.c.bf16 %v76_v58, %v76_v58  ;;  %v82_v63 = vpack.c.bf16 %v74_v62, %v74_v62  ;;  %v1082_v6 = vld [vmem:[%s1402_s2 + $0x1a0] sm:$0xff]  ;;  %v1073_v9 = vld [vmem:[%s1402_s2 + $0x158] sm:$0xff]  ;;  %v1064_v12 = vld [vmem:[%s1402_s2 + $0x110] sm:$0xff] }
  0x24   :  { %683 = vmatpush.bf16.msrb.mxu2 %v1085_v46  ;;  %613 = vmatmul.bf16.vlgmr.msra.gmra.mxu0 %v81_v57  ;;  %v1090_v7 = vld [vmem:[%s1402_s2 + $0x1e0] sm:$0xff]  ;;  %v1081_v10 = vld [vmem:[%s1402_s2 + $0x198] sm:$0xff]  ;;  %v1072_v13 = vld [vmem:[%s1402_s2 + $0x150] sm:$0xff] }
  0x25   :  { %696 = vmatpush.bf16.msrb.mxu3 %v1093_v47  ;;  %639 = vmatmul.bf16.vlgmr.msra.gmra.mxu2 %v83_v56  ;;  %v1089_v11 = vld [vmem:[%s1402_s2 + $0x1d8] sm:$0xff]  ;;  %v1080_v14 = vld [vmem:[%s1402_s2 + $0x190] sm:$0xff]  ;;  %v1063_v16 = vld [vmem:[%s1402_s2 + $0x108] sm:$0xff] }
  0x26   :  { %652 = vmatmul.bf16.vlgmr.msra.gmra.mxu3 %v84_v61  ;;  %658 = vmatpush.bf16.msrb.mxu0 %v1068_v54  ;;  %v1088_v15 = vld [vmem:[%s1402_s2 + $0x1d0] sm:$0xff]  ;;  %v1071_v17 = vld [vmem:[%s1402_s2 + $0x148] sm:$0xff]  ;;  %v60_v20 = vld.sshfl [vmem:[#allocation1 + $0x20] sm:$0xff pattern:$0x73625140] }
  0x27   :  { %671 = vmatpush.bf16.msrb.mxu1 %v1076_v55  ;;  %v1079_v18 = vld [vmem:[%s1402_s2 + $0x188] sm:$0xff]  ;;  %v62_v22 = vld.sshfl [vmem:[#allocation1 + $0x30] sm:$0xff pattern:$0x73625140]  ;;  %v1062_v24 = vld [vmem:[%s1402_s2 + $0x100] sm:$0xff]  ;;  %v77_v26 = vsel %vm72_vm0, %v1266_v39, %v60_v20 }
  0x28   :  { %684 = vmatpush.bf16.msrb.mxu2 %v1084_v59  ;;  %626 = vmatmul.bf16.vlgmr.msra.gmra.mxu1 %v82_v63  ;;  %v1087_v19 = vld [vmem:[%s1402_s2 + $0x1c8] sm:$0xff]  ;;  %v63_v23 = vld.sshfl [vmem:[#allocation1 + $0x38] sm:$0xff pattern:$0x73625140]  ;;  %v1070_v25 = vld [vmem:[%s1402_s2 + $0x140] sm:$0xff]  ;;  %v79_v30 = vsel %vm72_vm0, %v1279_v44, %v62_v22  ;;  %v85_v32 = vpack.c.bf16 %v77_v26, %v77_v26 }
  0x29   :  { %697 = vmatpush.bf16.msrb.mxu3 %v1092_v60  ;;  %v61_v21 = vld.sshfl [vmem:[#allocation1 + $0x28] sm:$0xff pattern:$0x73625140]  ;;  %v1078_v28 = vld [vmem:[%s1402_s2 + $0x180] sm:$0xff]  ;;  %v80_v31 = vsel %vm72_vm0, %v1281_v45, %v63_v23  ;;  %v87_v34 = vpack.c.bf16 %v79_v30, %v79_v30 }
  0x2a   :  { %659 = vmatpush.bf16.msrb.mxu0 %v1067_v0  ;;  %v78_v27 = vsel %vm72_vm0, %v1268_v40, %v61_v21  ;;  %v1086_v29 = vld [vmem:[%s1402_s2 + $0x1c0] sm:$0xff]  ;;  %v88_v35 = vpack.c.bf16 %v80_v31, %v80_v31  ;;  %v1095_v36 = vld [vmem:[%s1404_s4 + $0x8] sm:$0xff] }
  0x2b   :  { %672 = vmatpush.bf16.msrb.mxu1 %v1075_v1  ;;  %v86_v33 = vpack.c.bf16 %v78_v27, %v78_v27  ;;  %v1094_v42 = vld [vmem:[%s1404_s4] sm:$0xff] }
  0x2c   :  { %685 = vmatpush.bf16.msrb.mxu2 %v1083_v2  ;;  %v1097_v44 = vld [vmem:[%s1403_s3] ss:$0 sm:$0xff] }
  0x2d   :  { %698 = vmatpush.bf16.msrb.mxu3 %v1091_v3  ;;  %v1098_v1 = vld [vmem:[%s1405_s5] ss:$0 sm:$0xff] }
  0x2e   :  { %660 = vmatpush.bf16.msrb.mxu0 %v1066_v4 }
  0x2f   :  { %673 = vmatpush.bf16.msrb.mxu1 %v1074_v5 }
  0x30   :  { %686 = vmatpush.bf16.msrb.mxu2 %v1082_v6 }
  0x31   :  { %699 = vmatpush.bf16.msrb.mxu3 %v1090_v7 }
  0x32   :  { %661 = vmatpush.bf16.msrb.mxu0 %v1065_v8 }
  0x33   :  { %674 = vmatpush.bf16.msrb.mxu1 %v1073_v9 }
  0x34   :  { %687 = vmatpush.bf16.msrb.mxu2 %v1081_v10 }
  0x35   :  { %700 = vmatpush.bf16.msrb.mxu3 %v1089_v11 }
  0x36   :  { %662 = vmatpush.bf16.msrb.mxu0 %v1064_v12 }
  0x37   :  { %675 = vmatpush.bf16.msrb.mxu1 %v1072_v13 }
  0x38   :  { %688 = vmatpush.bf16.msrb.mxu2 %v1080_v14 }
  0x39   :  { %701 = vmatpush.bf16.msrb.mxu3 %v1088_v15 }
  0x3a   :  { %663 = vmatpush.bf16.msrb.mxu0 %v1063_v16 }
  0x3b   :  { %676 = vmatpush.bf16.msrb.mxu1 %v1071_v17 }
  0x3c   :  { %689 = vmatpush.bf16.msrb.mxu2 %v1079_v18 }
  0x3d   :  { %702 = vmatpush.bf16.msrb.mxu3 %v1087_v19 }
  0x3e   :  { %664 = vmatpush.bf16.msrb.mxu0 %v1062_v24 }
  0x3f   :  { %677 = vmatpush.bf16.msrb.mxu1 %v1070_v25 }
  0x40   :  { %690 = vmatpush.bf16.msrb.mxu2 %v1078_v28 }
  0x41   :  { %703 = vmatpush.bf16.msrb.mxu3 %v1086_v29  ;;  %665 = vmatmul.bf16.vlgmr.msrb.gmra.mxu0 %v85_v32 }
  0x42   :  { %678 = vmatmul.bf16.vlgmr.msrb.gmra.mxu1 %v86_v33  ;;  %741 = vmatpush.bf16.msra.mxu0 %v1095_v36 }
  0x43   :  { %691 = vmatmul.bf16.vlgmr.msrb.gmra.mxu2 %v87_v34 }
  0x44   :  { %704 = vmatmul.bf16.vlgmr.msrb.gmra.mxu3 %v88_v35 }
  0x46   :  { %742 = vmatpush.bf16.msra.mxu0 %v1094_v42 }
  0xa1   :  { %v614_v37 = vpop.f32.mrf.mxu0 }
  0xa2   :  { %v615_v47 = vadd.f32 %v1097_v44, %v614_v37 }
  0xa5   :  { %v627_v38 = vpop.f32.mrf.mxu1 }
  0xa6   :  { %v628_v48 = vadd.f32 %v627_v38, %v615_v47 }
  0xa8   :  { %v640_v39 = vpop.f32.mrf.mxu2 }
  0xa9   :  { %v653_v40 = vpop.f32.mrf.mxu3  ;;  %v616_v41 = vpop.f32.mrf.mxu0  ;;  %v641_v49 = vadd.f32 %v640_v39, %v628_v48 }
  0xab   :  { %v654_v50 = vadd.f32 %v653_v40, %v641_v49 }
  0xad   :  { %v629_v43 = vpop.f32.mrf.mxu1 }
  0xb0   :  { %v642_v45 = vpop.f32.mrf.mxu2 }
  0xb1   :  { %v655_v46 = vpop.f32.mrf.mxu3 }
  0xbe   :  { %v666_v51 = vpop.f32.mrf.mxu0 }
  0xbf   :  { %v679_v52 = vpop.f32.mrf.mxu1  ;;  %v667_v53 = vadd.f32 %v666_v51, %v654_v50 }
  0xc1   :  { %v680_v54 = vadd.f32 %v679_v52, %v667_v53 }
  0xc6   :  { %v692_v55 = vpop.f32.mrf.mxu2  ;;  %v668_v58 = vpop.f32.mrf.mxu0 }
  0xc7   :  { %v705_v56 = vpop.f32.mrf.mxu3  ;;  %v693_v57 = vadd.f32 %v692_v55, %v680_v54  ;;  %v681_v59 = vpop.f32.mrf.mxu1 }
  0xc9   :  { %v706_v60 = vadd.f32 %v705_v56, %v693_v57 }
  0xcb   :  { %v709_v61 = vmax.f32 %v706_v60, 0.0 }
  0xcd   :  { %v710_v62 = vpack.c.bf16 %v709_v61, %v709_v61 }
  0xce   :  { %v694_v63 = vpop.f32.mrf.mxu2 }
  0xcf   :  { %v707_v0 = vpop.f32.mrf.mxu3  ;;  %1029 = vmatmul.msk.bf16.vlgmr.msra.gmra.mxu0 %vm731_vm1, %v710_v62 }
 0x14c   :  { %v744_v2 = vpop.f32.mrf.mxu0 }
 0x14d   :  { %v745_v3 = vadd.f32 %v1098_v1, %v744_v2 }
 0x14f   :  { %748 = vst [vmem:[#allocation2] sm:$0xf] %v745_v3 }
 0x150   :  { %759 = dma.vmem_to_hbm [thread:$0]  %s755_s12, 64, %s757_s15, [#allocation3]  }
 0x154   :  { %v746_v4 = vpop.f32.mrf.mxu0 }
 0x155   :  { %1123 = dma.done.wait [#allocation3], 64  }
 0x156   :  { %1124 = vsyncadd [#allocation3], 4294967232 }
 0x157   :  { %764 = vsyncpa [#allocation3], 1 }

</bundles_post_ra>
